<compile_context>
chip_gen: v7x
topology: tpu7x:2x2x1
jax: 0.10.0
libtpu: 0.0.40
codegen_flags: <defaults>
</compile_context>

<pallas_src>
import functools

import numpy as np
import jax
import jax.numpy as jnp
from jax import lax
from jax.experimental import pallas as pl
from jax.experimental.pallas import tpu as pltpu


def _clb_kernel(x_ref, wf_ref, b_ref, mask_ref, o_ref, *,
                N, H, W, K, pad, Cin, Cout, activation):
    # x_ref    : (N*Cin, H*W)       input, NCHW with batch*channel on sublanes
    # wf_ref   : (Cout, K*K*Cin)    fused (squeeze @ expand) weight, cols (dy,dx,cin)
    # b_ref    : (Cout, 1)          squeeze bias
    # mask_ref : (K*K, H*W)         f32 "same"-padding halo masks (trace-time constant)
    # o_ref    : (N*Cout, H*W)      output, row order n*Cout + c
    HW = H * W
    x = x_ref[...]                                        # (N*Cin, HW)
    masks = mask_ref[...]                                 # (K*K, HW)

    # Build the im2col operand entirely in registers.  Tap (dy, dx) contributes
    # x[h+dy-pad, w+dx-pad] to output pixel (h, w); a shift of the flattened H*W
    # index is a lane rotation (XLU), out-of-image reads are zeroed by the mask.
    taps = []
    for dy in range(K):
        for dx in range(K):
            t = dy * K + dx
            delta = (dy - pad) * W + (dx - pad)
            rolled = x if delta == 0 else pltpu.roll(x, shift=(-delta) % HW, axis=1)
            taps.append(rolled * masks[t:t + 1, :])       # (N*Cin, HW)

    # Reassemble as (K*K*Cin, N*HW): rows ordered (tap, cin), lane blocks per batch.
    col = jnp.concatenate(
        [jnp.concatenate([tp[n * Cin:(n + 1) * Cin, :] for tp in taps], axis=0)
         for n in range(N)],
        axis=1)                                           # (K*K*Cin, N*HW)

    # Single fused (expand ∘ squeeze) matmul, then f32 bias + activation epilogue.
    out = jnp.dot(wf_ref[...], col,
                  preferred_element_type=jnp.float32)     # (Cout, N*HW)
    out = out + b_ref[...]                                # (Cout, 1) broadcasts
    if activation == "relu":
        out = jnp.maximum(out, 0.0)
    elif activation == "clipped":                         # nn.Hardtanh(0, 1)
        out = jnp.clip(out, 0.0, 1.0)
    # "identity": nothing to do.

    # One aligned, lane-dense (N*Cout, HW) store (row = n*Cout + c).
    o_ref[...] = jnp.concatenate(
        [out[:, n * HW:(n + 1) * HW] for n in range(N)], axis=0).astype(o_ref.dtype)


def make_compressed_linear_block(w_expand, w_squeeze, b_squeeze, activation="relu"):
    """One-time init (weight repack + squeeze/expand fusion); returns jitted apply(x).

    w_expand  : (Ctmp, Cin, K, K)   conv_expand.weight (bias=False)
    w_squeeze : (Cout, Ctmp, 1, 1)  conv_squeeze.weight
    b_squeeze : (Cout,)             conv_squeeze.bias
    """
    Ctmp, Cin, K, k2 = w_expand.shape
    assert k2 == K
    # Matches PyTorch padding=int((K-1)/2); "same"-size output requires odd K.
    assert K % 2 == 1, "same-size forward requires odd kernel_size"
    assert activation in ("relu", "identity", "clipped")
    # TODO(synk): 'prelu' needs the learned slope parameter wired into the kernel epilogue.
    Cout = w_squeeze.shape[0]
    pad = (K - 1) // 2

    # Fused weight: w_fused[o, (dy,dx,cin)] = sum_t ws[o,t] * we[t,cin,dy,dx].
    we_mat = jnp.transpose(w_expand, (0, 2, 3, 1)).reshape(Ctmp, K * K * Cin)
    ws_mat = w_squeeze.reshape(Cout, Ctmp)
    w_fused = jnp.dot(ws_mat, we_mat)                      # (Cout, K*K*Cin), once
    b_col = b_squeeze.reshape(Cout, 1)                     # (Cout, 1)

    @jax.jit
    def apply(x_nchw):
        N, cin_x, H, W = x_nchw.shape
        assert cin_x == Cin
        HW = H * W

        # Halo masks depend only on shapes -> numpy at trace time, baked in as a constant.
        hh = np.arange(HW) // W
        ww = np.arange(HW) % W
        masks = np.stack([
            ((hh + dy - pad >= 0) & (hh + dy - pad < H) &
             (ww + dx - pad >= 0) & (ww + dx - pad < W)).astype(np.float32)
            for dy in range(K) for dx in range(K)])        # (K*K, HW)

        kernel = functools.partial(
            _clb_kernel, N=N, H=H, W=W, K=K, pad=pad,
            Cin=Cin, Cout=Cout, activation=activation)

        out2d = pl.pallas_call(
            kernel,
            out_shape=jax.ShapeDtypeStruct((N * Cout, HW), x_nchw.dtype),
            in_specs=[pl.BlockSpec(memory_space=pltpu.MemorySpace.VMEM)] * 4,
            out_specs=pl.BlockSpec(memory_space=pltpu.MemorySpace.VMEM),
        )(x_nchw.reshape(N * Cin, HW), w_fused, b_col, jnp.asarray(masks))

        return out2d.reshape(N, Cout, H, W)                # free reshape, already NCHW

    return apply


def _reference(x_nchw, w_expand, w_squeeze, b_squeeze):
    """Pure-JAX reference mirroring the PyTorch forward pass (activation='relu')."""
    pad = (w_expand.shape[2] - 1) // 2
    y = lax.conv_general_dilated(
        x_nchw, w_expand, window_strides=(1, 1),
        padding=[(pad, pad), (pad, pad)],
        dimension_numbers=("NCHW", "OIHW", "NCHW"))
    y = lax.conv_general_dilated(
        y, w_squeeze, window_strides=(1, 1), padding="VALID",
        dimension_numbers=("NCHW", "OIHW", "NCHW"))
    y = y + b_squeeze[None, :, None, None]
    return jnp.maximum(y, 0.0)


if __name__ == "__main__":
    # CompressedLinearBlock(in_channels=4, out_channels=4, tmp_channels=8,
    #                       kernel_size=3, activation='relu')
    N, Cin, H, W = 2, 4, 16, 16
    Ctmp, Cout, K = 8, 4, 3

    key = jax.random.PRNGKey(0)
    k_x, k_we, k_ws, k_b = jax.random.split(key, 4)
    x = jax.random.normal(k_x, (N, Cin, H, W), dtype=jnp.float32)
    w_expand = jax.random.normal(k_we, (Ctmp, Cin, K, K), dtype=jnp.float32) * 0.1
    w_squeeze = jax.random.normal(k_ws, (Cout, Ctmp, 1, 1), dtype=jnp.float32) * 0.1
    b_squeeze = jax.random.normal(k_b, (Cout,), dtype=jnp.float32) * 0.1

    block = make_compressed_linear_block(x_expand := w_expand, w_squeeze, b_squeeze,
                                         activation="relu")
    out = jax.block_until_ready(block(x))

    ref = jax.block_until_ready(_reference(x, w_expand, w_squeeze, b_squeeze))
    assert out.shape == (N, Cout, H, W)
    err = float(jnp.max(jnp.abs(out - ref)))
    assert jnp.allclose(out, ref, atol=1e-4, rtol=1e-4), \
        f"mismatch vs reference (max abs err {err})"

    print("KERNEL_OK")
</pallas_src>

<mosaic_0001>
module attributes {stable_mosaic.version = 11 : i64} {
  func.func @_clb_kernel(%arg0: memref<8x256xf32, #tpu.memory_space<vmem>>, %arg1: memref<4x36xf32, #tpu.memory_space<vmem>>, %arg2: memref<4x1xf32, #tpu.memory_space<vmem>>, %arg3: memref<9x256xf32, #tpu.memory_space<vmem>>, %arg4: memref<8x256xf32, #tpu.memory_space<vmem>>) attributes {dimension_semantics = [], scalar_prefetch = 0 : i64, scratch_operands = 0 : i64, tpu.core_type = #tpu.core_type<tc>} {
    %c0 = arith.constant 0 : index
    %c0_0 = arith.constant 0 : index
    %0 = vector.load %arg0[%c0, %c0_0] : memref<8x256xf32, #tpu.memory_space<vmem>>, vector<8x256xf32>
    %c0_1 = arith.constant 0 : index
    %c0_2 = arith.constant 0 : index
    %1 = vector.load %arg3[%c0_1, %c0_2] : memref<9x256xf32, #tpu.memory_space<vmem>>, vector<9x256xf32>
    %c17_i32 = arith.constant 17 : i32
    %2 = tpu.dynamic_rotate %0 by %c17_i32 dim 1 : vector<8x256xf32>, i32 -> vector<8x256xf32>
    %3 = vector.extract_strided_slice %1 {offsets = [0, 0], sizes = [1, 256], strides = [1, 1]} : vector<9x256xf32> to vector<1x256xf32>
    %4 = vector.broadcast %3 : vector<1x256xf32> to vector<8x256xf32>
    %5 = arith.mulf %2, %4 : vector<8x256xf32>
    %c16_i32 = arith.constant 16 : i32
    %6 = tpu.dynamic_rotate %0 by %c16_i32 dim 1 : vector<8x256xf32>, i32 -> vector<8x256xf32>
    %7 = vector.extract_strided_slice %1 {offsets = [1, 0], sizes = [1, 256], strides = [1, 1]} : vector<9x256xf32> to vector<1x256xf32>
    %8 = vector.broadcast %7 : vector<1x256xf32> to vector<8x256xf32>
    %9 = arith.mulf %6, %8 : vector<8x256xf32>
    %c15_i32 = arith.constant 15 : i32
    %10 = tpu.dynamic_rotate %0 by %c15_i32 dim 1 : vector<8x256xf32>, i32 -> vector<8x256xf32>
    %11 = vector.extract_strided_slice %1 {offsets = [2, 0], sizes = [1, 256], strides = [1, 1]} : vector<9x256xf32> to vector<1x256xf32>
    %12 = vector.broadcast %11 : vector<1x256xf32> to vector<8x256xf32>
    %13 = arith.mulf %10, %12 : vector<8x256xf32>
    %c1_i32 = arith.constant 1 : i32
    %14 = tpu.dynamic_rotate %0 by %c1_i32 dim 1 : vector<8x256xf32>, i32 -> vector<8x256xf32>
    %15 = vector.extract_strided_slice %1 {offsets = [3, 0], sizes = [1, 256], strides = [1, 1]} : vector<9x256xf32> to vector<1x256xf32>
    %16 = vector.broadcast %15 : vector<1x256xf32> to vector<8x256xf32>
    %17 = arith.mulf %14, %16 : vector<8x256xf32>
    %18 = vector.extract_strided_slice %1 {offsets = [4, 0], sizes = [1, 256], strides = [1, 1]} : vector<9x256xf32> to vector<1x256xf32>
    %19 = vector.broadcast %18 : vector<1x256xf32> to vector<8x256xf32>
    %20 = arith.mulf %0, %19 : vector<8x256xf32>
    %c255_i32 = arith.constant 255 : i32
    %21 = tpu.dynamic_rotate %0 by %c255_i32 dim 1 : vector<8x256xf32>, i32 -> vector<8x256xf32>
    %22 = vector.extract_strided_slice %1 {offsets = [5, 0], sizes = [1, 256], strides = [1, 1]} : vector<9x256xf32> to vector<1x256xf32>
    %23 = vector.broadcast %22 : vector<1x256xf32> to vector<8x256xf32>
    %24 = arith.mulf %21, %23 : vector<8x256xf32>
    %c241_i32 = arith.constant 241 : i32
    %25 = tpu.dynamic_rotate %0 by %c241_i32 dim 1 : vector<8x256xf32>, i32 -> vector<8x256xf32>
    %26 = vector.extract_strided_slice %1 {offsets = [6, 0], sizes = [1, 256], strides = [1, 1]} : vector<9x256xf32> to vector<1x256xf32>
    %27 = vector.broadcast %26 : vector<1x256xf32> to vector<8x256xf32>
    %28 = arith.mulf %25, %27 : vector<8x256xf32>
    %c240_i32 = arith.constant 240 : i32
    %29 = tpu.dynamic_rotate %0 by %c240_i32 dim 1 : vector<8x256xf32>, i32 -> vector<8x256xf32>
    %30 = vector.extract_strided_slice %1 {offsets = [7, 0], sizes = [1, 256], strides = [1, 1]} : vector<9x256xf32> to vector<1x256xf32>
    %31 = vector.broadcast %30 : vector<1x256xf32> to vector<8x256xf32>
    %32 = arith.mulf %29, %31 : vector<8x256xf32>
    %c239_i32 = arith.constant 239 : i32
    %33 = tpu.dynamic_rotate %0 by %c239_i32 dim 1 : vector<8x256xf32>, i32 -> vector<8x256xf32>
    %34 = vector.extract_strided_slice %1 {offsets = [8, 0], sizes = [1, 256], strides = [1, 1]} : vector<9x256xf32> to vector<1x256xf32>
    %35 = vector.broadcast %34 : vector<1x256xf32> to vector<8x256xf32>
    %36 = arith.mulf %33, %35 : vector<8x256xf32>
    %37 = vector.extract_strided_slice %5 {offsets = [0, 0], sizes = [4, 256], strides = [1, 1]} : vector<8x256xf32> to vector<4x256xf32>
    %38 = vector.extract_strided_slice %9 {offsets = [0, 0], sizes = [4, 256], strides = [1, 1]} : vector<8x256xf32> to vector<4x256xf32>
    %39 = vector.extract_strided_slice %13 {offsets = [0, 0], sizes = [4, 256], strides = [1, 1]} : vector<8x256xf32> to vector<4x256xf32>
    %40 = vector.extract_strided_slice %17 {offsets = [0, 0], sizes = [4, 256], strides = [1, 1]} : vector<8x256xf32> to vector<4x256xf32>
    %41 = vector.extract_strided_slice %20 {offsets = [0, 0], sizes = [4, 256], strides = [1, 1]} : vector<8x256xf32> to vector<4x256xf32>
    %42 = vector.extract_strided_slice %24 {offsets = [0, 0], sizes = [4, 256], strides = [1, 1]} : vector<8x256xf32> to vector<4x256xf32>
    %43 = vector.extract_strided_slice %28 {offsets = [0, 0], sizes = [4, 256], strides = [1, 1]} : vector<8x256xf32> to vector<4x256xf32>
    %44 = vector.extract_strided_slice %32 {offsets = [0, 0], sizes = [4, 256], strides = [1, 1]} : vector<8x256xf32> to vector<4x256xf32>
    %45 = vector.extract_strided_slice %36 {offsets = [0, 0], sizes = [4, 256], strides = [1, 1]} : vector<8x256xf32> to vector<4x256xf32>
    %46 = tpu.concatenate %37, %38, %39, %40, %41, %42, %43, %44, %45 in 0 : vector<4x256xf32>, vector<4x256xf32>, vector<4x256xf32>, vector<4x256xf32>, vector<4x256xf32>, vector<4x256xf32>, vector<4x256xf32>, vector<4x256xf32>, vector<4x256xf32> -> vector<36x256xf32>
    %47 = vector.extract_strided_slice %5 {offsets = [4, 0], sizes = [4, 256], strides = [1, 1]} : vector<8x256xf32> to vector<4x256xf32>
    %48 = vector.extract_strided_slice %9 {offsets = [4, 0], sizes = [4, 256], strides = [1, 1]} : vector<8x256xf32> to vector<4x256xf32>
    %49 = vector.extract_strided_slice %13 {offsets = [4, 0], sizes = [4, 256], strides = [1, 1]} : vector<8x256xf32> to vector<4x256xf32>
    %50 = vector.extract_strided_slice %17 {offsets = [4, 0], sizes = [4, 256], strides = [1, 1]} : vector<8x256xf32> to vector<4x256xf32>
    %51 = vector.extract_strided_slice %20 {offsets = [4, 0], sizes = [4, 256], strides = [1, 1]} : vector<8x256xf32> to vector<4x256xf32>
    %52 = vector.extract_strided_slice %24 {offsets = [4, 0], sizes = [4, 256], strides = [1, 1]} : vector<8x256xf32> to vector<4x256xf32>
    %53 = vector.extract_strided_slice %28 {offsets = [4, 0], sizes = [4, 256], strides = [1, 1]} : vector<8x256xf32> to vector<4x256xf32>
    %54 = vector.extract_strided_slice %32 {offsets = [4, 0], sizes = [4, 256], strides = [1, 1]} : vector<8x256xf32> to vector<4x256xf32>
    %55 = vector.extract_strided_slice %36 {offsets = [4, 0], sizes = [4, 256], strides = [1, 1]} : vector<8x256xf32> to vector<4x256xf32>
    %56 = tpu.concatenate %47, %48, %49, %50, %51, %52, %53, %54, %55 in 0 : vector<4x256xf32>, vector<4x256xf32>, vector<4x256xf32>, vector<4x256xf32>, vector<4x256xf32>, vector<4x256xf32>, vector<4x256xf32>, vector<4x256xf32>, vector<4x256xf32> -> vector<36x256xf32>
    %57 = tpu.concatenate %46, %56 in 1 : vector<36x256xf32>, vector<36x256xf32> -> vector<36x512xf32>
    %c0_3 = arith.constant 0 : index
    %c0_4 = arith.constant 0 : index
    %58 = vector.load %arg1[%c0_3, %c0_4] : memref<4x36xf32, #tpu.memory_space<vmem>>, vector<4x36xf32>
    %cst = arith.constant dense<0.000000e+00> : vector<4x512xf32>
    %59 = tpu.matmul %58, %57, %cst {dimension_numbers = #tpu.dot_dimension_numbers<[1], [0], [0], [1], [0, 0, 1, 1], [], []>} : vector<4x36xf32>, vector<36x512xf32>, vector<4x512xf32> -> vector<4x512xf32>
    %c0_5 = arith.constant 0 : index
    %c0_6 = arith.constant 0 : index
    %60 = vector.load %arg2[%c0_5, %c0_6] : memref<4x1xf32, #tpu.memory_space<vmem>>, vector<4x1xf32>
    %61 = vector.broadcast %60 : vector<4x1xf32> to vector<4x512xf32>
    %62 = arith.addf %59, %61 : vector<4x512xf32>
    %cst_7 = arith.constant 0.000000e+00 : f32
    %63 = vector.broadcast %cst_7 : f32 to vector<4x512xf32>
    %64 = arith.maximumf %62, %63 : vector<4x512xf32>
    %65 = vector.extract_strided_slice %64 {offsets = [0, 0], sizes = [4, 256], strides = [1, 1]} : vector<4x512xf32> to vector<4x256xf32>
    %66 = vector.extract_strided_slice %64 {offsets = [0, 256], sizes = [4, 256], strides = [1, 1]} : vector<4x512xf32> to vector<4x256xf32>
    %67 = tpu.concatenate %65, %66 in 0 : vector<4x256xf32>, vector<4x256xf32> -> vector<8x256xf32>
    %c0_8 = arith.constant 0 : index
    %c0_9 = arith.constant 0 : index
    %68 = vector.load %arg4[%c0_8, %c0_9] : memref<8x256xf32, #tpu.memory_space<vmem>>, vector<8x256xf32>
    tpu.vector_store %arg4[%c0_8, %c0_9], %67 {strides = array<i32>} : memref<8x256xf32, #tpu.memory_space<vmem>>, vector<8x256xf32>,
    return
  }
}

</mosaic_0001>

<bundles_post_ra>
// kernel: apply.1
= control target key start
LH: loop header
LB: loop body
LE: loop exit
PB: predicated region body
PF: predicated region fallthrough
CT: control target
= control target key end

     0   :  { %s454_s17 = smov 15   ;;  %s455_s18 = smov 17   ;;  %v460_v2 = vmov 0.0   ;;  %v462_v3 = vmov 0   ;;  %v27_v5 = vlaneseq  ;;  %vm195_vm4 = vcmask 1043456   ;;  %s627_s0 = inlined_call_operand.vmem [shape: f32[8,256], index: 0, kind: input, shape index: {}]   ;;  %s628_s2 = inlined_call_operand.vmem [shape: f32[4,1], index: 2, kind: input, shape index: {}]   ;;  %s629_s3 = inlined_call_operand.vmem [shape: f32[9,256], index: 3, kind: input, shape index: {}]   ;;  %s630_s1 = inlined_call_operand.vmem [shape: f32[4,36], index: 1, kind: input, shape index: {}]   ;;  %s631_s4 = inlined_call_operand.vmem [shape: f32[8,256], index: 4, kind: output, shape index: {}]  }
   0x1   :  { %v492_v0 = vld [vmem:[%s627_s0] sm:$0xff]  ;;  %v499_v1 = vld [vmem:[%s627_s0 + $0x8] sm:$0xff]  ;;  %s456_s21 = smov 16   ;;  %s457_s22 = smov 1   ;;  %394 = vmatprep.mubr.f32.mxu1 %v460_v2  ;;  %323 = vmatprep.mubr.f32.mxu0 %v460_v2  ;;  %vm247_vm9 = vcmask 293888  }
   0x2   :  { %59 = vrot.lane.b32.xlu1 %v492_v0, %s454_s17  ;;  %23 = vrot.lane.b32.xlu0 %v492_v0, %s455_s18  ;;  %s458_s23 = smov 113   ;;  %s459_s0 = smov 127   ;;  %v241_v4 = vld [vmem:[%s628_s2] sm:$0xf]  ;;  %v518_v6 = vshrl.u32 %v27_v5, 7  ;;  %v520_v7 = vand.u32 127, %v27_v5 }
   0x3   :  { %s461_s24 = smov 112   ;;  %453 = vset.pattern.permute.xlu0 %v462_v3  ;;  %s463_s25 = smov 111   ;;  %v526_v11 = vld [vmem:[%s629_s3] sm:$0xff]  ;;  %v531_v12 = vld [vmem:[%s629_s3 + $0x8] sm:$0xff] }
   0x4   :  { %v68_v10 = vsub.s32 2, %v518_v6  ;;  %v34_v13 = vsub.s32 0, %v518_v6  ;;  %vm63_vm0 = vcmp.lt.s32.totalorder %v520_v7, 15  ;;  %v51_v14 = vsub.s32 1, %v518_v6 }
   0x5   :  { %vm29_vm1 = vcmp.lt.s32.totalorder %v520_v7, 17  ;;  %vm46_vm2 = vcmp.lt.s32.totalorder %v520_v7, 16  ;;  %v85_v19 = vsub.s32 3, %v518_v6  ;;  %vm80_vm3 = vcmp.lt.s32.totalorder %v520_v7, 1 }
   0x6   :  { %61 = vrot.lane.b32.xlu1 %v499_v1, %s454_s17  ;;  %25 = vrot.lane.b32.xlu0 %v499_v1, %s455_s18  ;;  %v69_v15 = vrot.slane %v526_v11, %v68_v10  ;;  %v73_v16 = vrot.slane %v531_v12, %v68_v10  ;;  %v35_v22 = vrot.slane %v526_v11, %v34_v13  ;;  %v129_v28 = vsub.s32 6, %v518_v6 }
   0x7   :  { %v39_v23 = vrot.slane %v531_v12, %v34_v13  ;;  %v52_v26 = vrot.slane %v526_v11, %v51_v14  ;;  %v56_v27 = vrot.slane %v531_v12, %v51_v14  ;;  %v112_v29 = vsub.s32 5, %v518_v6 }
   0x8   :  { %vm124_vm5 = vcmp.lt.s32.totalorder %v520_v7, 113  ;;  %v95_v34 = vsub.s32 4, %v518_v6  ;;  %v86_v41 = vrot.slane %v526_v11, %v85_v19  ;;  %v90_v42 = vrot.slane %v531_v12, %v85_v19 }
   0x9   :  { %v130_v43 = vrot.slane %v526_v11, %v129_v28  ;;  %v134_v44 = vrot.slane %v531_v12, %v129_v28  ;;  %vm107_vm6 = vcmp.lt.s32.totalorder %v520_v7, 127  ;;  %v113_v45 = vrot.slane %v526_v11, %v112_v29 }
   0xa   :  { %44 = vrot.lane.b32.xlu1 %v499_v1, %s456_s21  ;;  %42 = vrot.lane.b32.xlu0 %v492_v0, %s456_s21  ;;  %v100_v50 = vrot.slane %v531_v12, %v95_v34  ;;  %v96_v51 = vrot.slane %v526_v11, %v95_v34  ;;  %v117_v62 = vrot.slane %v531_v12, %v112_v29  ;;  %v146_v63 = vsub.s32 7, %v518_v6 }
   0xb   :  { %vm141_vm7 = vcmp.lt.s32.totalorder %v520_v7, 112  ;;  %vm158_vm8 = vcmp.lt.s32.totalorder %v520_v7, 111  ;;  %v240_v7 = vld [vmem:[%s630_s1] sm:$0xf] }
   0xc   :  { %v102_v14 = vmul.f32 %v100_v50, %v499_v1 }
   0xe   :  { %78 = vrot.lane.b32.xlu1 %v499_v1, %s457_s22  ;;  %76 = vrot.lane.b32.xlu0 %v492_v0, %s457_s22 }
  0x12   :  { %122 = vrot.lane.b32.xlu1 %v499_v1, %s458_s23  ;;  %120 = vrot.lane.b32.xlu0 %v492_v0, %s458_s23 }
  0x16   :  { %105 = vrot.lane.b32.xlu1 %v499_v1, %s459_s0  ;;  %103 = vrot.lane.b32.xlu0 %v492_v0, %s459_s0 }
  0x1a   :  { %139 = vrot.lane.b32.xlu1 %v499_v1, %s461_s24  ;;  %137 = vrot.lane.b32.xlu0 %v492_v0, %s461_s24 }
  0x1e   :  { %156 = vrot.lane.b32.xlu1 %v499_v1, %s463_s25  ;;  %154 = vrot.lane.b32.xlu0 %v492_v0, %s463_s25 }
  0x22   :  { %244 = vperm.xlu0 %453, %v241_v4  }
  0x74   :  { %v60_v8 = vpop.permute.xlu1 %59  ;;  %v24_v9 = vpop.permute.xlu0 %23 }
  0x78   :  { %v62_v17 = vpop.permute.xlu1 %61  ;;  %v26_v18 = vpop.permute.xlu0 %25 }
  0x79   :  { %v64_v20 = vsel %vm63_vm0, %v60_v8, %v62_v17  ;;  %v65_v21 = vsel %vm63_vm0, %v62_v17, %v60_v8  ;;  %v30_v24 = vsel %vm29_vm1, %v24_v9, %v26_v18  ;;  %v31_v25 = vsel %vm29_vm1, %v26_v18, %v24_v9 }
  0x7a   :  { %v74_v30 = vmul.f32 %v69_v15, %v65_v21  ;;  %v75_v31 = vmul.f32 %v73_v16, %v64_v20  ;;  %v40_v35 = vmul.f32 %v35_v22, %v31_v25  ;;  %v41_v36 = vmul.f32 %v39_v23, %v30_v24 }
  0x7b   :  { %v101_v15 = vmul.f32 %v96_v51, %v492_v0  ;;  %v147_v25 = vrot.slane %v526_v11, %v146_v63 }
  0x7c   :  { %v45_v32 = vpop.permute.xlu1 %44  ;;  %v43_v33 = vpop.permute.xlu0 %42  ;;  %v212_v46 = vrot.slane %v74_v30, 4  ;;  %v213_v47 = vrot.slane %v75_v31, 4  ;;  %v206_v52 = vrot.slane %v40_v35, 4  ;;  %v207_v53 = vrot.slane %v41_v36, 4 }
  0x7d   :  { %v47_v37 = vsel %vm46_vm2, %v43_v33, %v45_v32  ;;  %v48_v38 = vsel %vm46_vm2, %v45_v32, %v43_v33  ;;  %v218_v32 = vrot.slane %v101_v15, 4 }
  0x7e   :  { %v57_v39 = vmul.f32 %v52_v26, %v48_v38  ;;  %v58_v40 = vmul.f32 %v56_v27, %v47_v37  ;;  %v151_v26 = vrot.slane %v531_v12, %v146_v63 }
  0x80   :  { %v79_v48 = vpop.permute.xlu1 %78  ;;  %v77_v49 = vpop.permute.xlu0 %76  ;;  %v173_v56 = vrot.slane %v57_v39, 4  ;;  %v174_v57 = vrot.slane %v58_v40, 4  ;;  %v233_v60 = vsel %vm195_vm4, %v207_v53, %v58_v40  ;;  %v232_v61 = vsel %vm195_vm4, %v206_v52, %v57_v39 }
  0x81   :  { %v81_v54 = vsel %vm80_vm3, %v77_v49, %v79_v48  ;;  %v82_v55 = vsel %vm80_vm3, %v79_v48, %v77_v49 }
  0x82   :  { %v91_v58 = vmul.f32 %v86_v41, %v82_v55  ;;  %v92_v59 = vmul.f32 %v90_v42, %v81_v54  ;;  %v197_v16 = vsel %vm195_vm4, %v41_v36, %v174_v57  ;;  %v196_v6 = vsel %vm195_vm4, %v40_v35, %v173_v56  ;;  %v419_v41 = vld [vmem:[%s629_s3 + $0x10] ss:$0 sm:$0xff]  ;;  %v420_v42 = vld [vmem:[%s629_s3 + $0x18] ss:$0 sm:$0xff] }
  0x84   :  { %v179_v2 = vrot.slane %v91_v58, 4  ;;  %v180_v3 = vrot.slane %v92_v59, 4  ;;  %v123_v4 = vpop.permute.xlu1 %122  ;;  %v121_v5 = vpop.permute.xlu0 %120  ;;  %v235_v8 = vsel %vm195_vm4, %v213_v47, %v92_v59  ;;  %v234_v9 = vsel %vm195_vm4, %v212_v46, %v91_v58 }
  0x85   :  { %v435_v10 = vpack.c.bf16 %v235_v8, %v233_v60  ;;  %v437_v13 = vpack.c.bf16 %v234_v9, %v232_v61  ;;  %v125_v19 = vsel %vm124_vm5, %v121_v5, %v123_v4  ;;  %v126_v20 = vsel %vm124_vm5, %v123_v4, %v121_v5 }
  0x86   :  { %v199_v17 = vsel %vm195_vm4, %v75_v31, %v180_v3  ;;  %v198_v18 = vsel %vm195_vm4, %v74_v30, %v179_v2  ;;  %v135_v27 = vmul.f32 %v130_v43, %v125_v19  ;;  %v136_v28 = vmul.f32 %v134_v44, %v126_v20 }
  0x87   :  { %436 = vmatprep.subr.bf16.mxu1 %v435_v10  ;;  %v427_v21 = vpack.c.bf16 %v199_v17, %v197_v16  ;;  %v429_v22 = vpack.c.bf16 %v198_v18, %v196_v6  ;;  %v219_v31 = vrot.slane %v102_v14, 4 }
  0x88   :  { %v106_v1 = vpop.permute.xlu1 %105  ;;  %438 = vmatpush1.bf16.msra.mxu1 %v437_v13  ;;  %v104_v0 = vpop.permute.xlu0 %103  ;;  %v224_v11 = vrot.slane %v135_v27, 4  ;;  %v225_v12 = vrot.slane %v136_v28, 4 }
  0x89   :  { %v108_v23 = vsel %vm107_vm6, %v104_v0, %v106_v1  ;;  %v109_v24 = vsel %vm107_vm6, %v106_v1, %v104_v0  ;;  %428 = vmatprep.subr.bf16.mxu0 %v427_v21 }
  0x8a   :  { %v118_v29 = vmul.f32 %v113_v45, %v108_v23  ;;  %v119_v30 = vmul.f32 %v117_v62, %v109_v24  ;;  %430 = vmatpush1.bf16.msra.mxu0 %v429_v22 }
  0x8c   :  { %v185_v33 = vrot.slane %v118_v29, 4  ;;  %v186_v34 = vrot.slane %v119_v30, 4  ;;  %v140_v35 = vpop.permute.xlu1 %139  ;;  %v138_v36 = vpop.permute.xlu0 %137  ;;  %v237_v43 = vsel %vm195_vm4, %v219_v31, %v119_v30  ;;  %v236_v44 = vsel %vm195_vm4, %v218_v32, %v118_v29 }
  0x8d   :  { %v142_v37 = vsel %vm141_vm7, %v138_v36, %v140_v35  ;;  %v143_v38 = vsel %vm141_vm7, %v140_v35, %v138_v36 }
  0x8e   :  { %v152_v39 = vmul.f32 %v147_v25, %v142_v37  ;;  %v153_v40 = vmul.f32 %v151_v26, %v143_v38  ;;  %v201_v45 = vsel %vm195_vm4, %v102_v14, %v186_v34  ;;  %v200_v46 = vsel %vm195_vm4, %v101_v15, %v185_v33 }
  0x90   :  { %v191_v47 = vrot.slane %v152_v39, 4  ;;  %v192_v48 = vrot.slane %v153_v40, 4  ;;  %v157_v49 = vpop.permute.xlu1 %156  ;;  %v155_v50 = vpop.permute.xlu0 %154  ;;  %v239_v51 = vsel %vm195_vm4, %v225_v12, %v153_v40  ;;  %v238_v52 = vsel %vm195_vm4, %v224_v11, %v152_v39 }
  0x91   :  { %v159_v53 = vsel %vm158_vm8, %v155_v50, %v157_v49  ;;  %v160_v54 = vsel %vm158_vm8, %v157_v49, %v155_v50  ;;  %v439_v55 = vpack.c.bf16 %v239_v51, %v237_v43  ;;  %v441_v56 = vpack.c.bf16 %v238_v52, %v236_v44 }
  0x92   :  { %v169_v57 = vmul.f32 %v419_v41, %v159_v53  ;;  %v170_v58 = vmul.f32 %v420_v42, %v160_v54  ;;  %v203_v59 = vsel %vm195_vm4, %v136_v28, %v192_v48  ;;  %v202_v60 = vsel %vm195_vm4, %v135_v27, %v191_v47 }
  0x93   :  { %440 = vmatprep.subr.bf16.mxu1 %v439_v55  ;;  %v431_v61 = vpack.c.bf16 %v203_v59, %v201_v45  ;;  %v433_v62 = vpack.c.bf16 %v202_v60, %v200_v46 }
  0x94   :  { %v230_v63 = vrot.slane %v169_v57, 4  ;;  %v231_v2 = vrot.slane %v170_v58, 4  ;;  %442 = vmatpush1.bf16.msra.mxu1 %v441_v56 }
  0x95   :  { %432 = vmatprep.subr.bf16.mxu0 %v431_v61 }
  0x96   :  { %434 = vmatpush1.bf16.msra.mxu0 %v433_v62  ;;  %424 = vmatprep.subr.msk.mxu1 %vm195_vm4, %v231_v2 }
  0x97   :  { %421 = vmatprep.subr.msk.mxu0 %vm195_vm4, %v170_v58 }
  0x98   :  { %425 = vmatpush1.msk.msra.mxu1 %vm195_vm4, %v230_v63 }
  0x99   :  { %426 = vmatmul.mubr.msk.f32.vlgmr.msra.gmra.mrb[0].mxu1 %vm247_vm9, %v240_v7 }
  0x9a   :  { %422 = vmatpush1.msk.msra.mxu0 %vm195_vm4, %v169_v57 }
  0x9b   :  { %423 = vmatmul.mubr.msk.f32.vlgmr.msra.gmra.mrb[0].mxu0 %vm247_vm9, %v240_v7 }
  0xa1   :  { %v245_v3 = vpop.permute.xlu0 %244 }
 0x16c   :  { %v396_v4 = vpop.f32.mrb[0].mxu1 }
 0x16d   :  { %v397_v5 = vadd.f32 %v396_v4, %v245_v3  ;;  %v398_v8 = vpop.f32.mrb[1].mxu1 }
 0x16e   :  { %v399_v9 = vadd.f32 %v398_v8, %v245_v3  ;;  %v325_v10 = vpop.f32.mrb[0].mxu0 }
 0x16f   :  { %v403_v13 = vmax.f32 %v397_v5, 0.0  ;;  %v326_v14 = vadd.f32 %v325_v10, %v245_v3  ;;  %v327_v15 = vpop.f32.mrb[1].mxu0 }
 0x170   :  { %v404_v16 = vmax.f32 %v399_v9, 0.0  ;;  %v328_v17 = vadd.f32 %v327_v15, %v245_v3 }
 0x171   :  { %v407_v6 = vrot.slane %v403_v13, 4  ;;  %v401_v18 = vmax.f32 %v326_v14, 0.0 }
 0x172   :  { %v408_v19 = vrot.slane %v404_v16, 4  ;;  %v402_v20 = vmax.f32 %v328_v17, 0.0 }
 0x173   :  { %v411_v21 = vsel %vm195_vm4, %v401_v18, %v407_v6 }
 0x174   :  { %413 = vst [vmem:[%s631_s4] sm:$0xff] %v411_v21  ;;  %v412_v22 = vsel %vm195_vm4, %v402_v20, %v408_v19 }
 0x175   :  { %414 = vst [vmem:[%s631_s4 + $0x8] sm:$0xff] %v412_v22 }

</bundles_post_ra>
